<compile_context>
chip_gen: v7x
topology: tpu7x:2x2x1
jax: 0.10.0
libtpu: 0.0.40
codegen_flags: <defaults>
</compile_context>

<pallas_src>
import functools

import jax
import jax.numpy as jnp
from jax.experimental import pallas as pl
from jax.experimental.pallas import tpu as pltpu


def _round_up(n, m):
    return ((n + m - 1) // m) * m


def _mlp_kernel(xT_ref, w1T_ref, b1_ref, w2T_ref, b2_ref, w3_ref, b3_ref, out_ref,
                *, l1_use_mxu):
    # xT_ref : (obs, TB)   f32                  streamed per grid step (lane-dense)
    # w1T_ref: (128, obs)  bf16 (MXU) / f32 (VPU)  VMEM-resident
    # b1_ref : (128, 1)    f32                  VMEM-resident
    # w2T_ref: (64, 128)   bf16                 VMEM-resident (MXU operand)
    # b2_ref : (64, 1)     f32                  VMEM-resident
    # w3_ref : (64, 1)     f32                  VMEM-resident
    # b3_ref : (1,)        f32                  SMEM scalar
    # out_ref: (1, TB)     f32                  streamed per grid step (lane-dense)
    xT = xT_ref[...]
    obs = xT.shape[0]

    # ---- layer 1: Linear(obs -> 128) + ReLU, feature-major: h1T = W1^T @ x^T ----
    if l1_use_mxu:
        # bf16 MXU dot (hardware zero-pads the tiny K); w1T was pre-cast in the
        # wrapper so nothing resident is re-cast per grid step.
        h1T = jnp.dot(w1T_ref[...], xT.astype(jnp.bfloat16),
                      preferred_element_type=jnp.float32)
    else:
        # Degenerate contraction depth: `obs` f32 broadcast MACs on the VPU
        # (full precision, no K-padded MXU waste, no bf16 VALU needed on v5e).
        w1T = w1T_ref[...]
        h1T = w1T[:, 0:1] * xT[0:1, :]
        for k in range(1, obs):
            h1T = h1T + w1T[:, k:k + 1] * xT[k:k + 1, :]
    h1T = jnp.maximum(h1T + b1_ref[...], 0.0)                       # (128, TB)

    # ---- layer 2: Linear(128 -> 64) + ReLU on the MXU (bf16 mul / f32 acc).
    #      In this orientation N = TILE_B fully fills the MXU lanes. ----
    h2T = jnp.dot(w2T_ref[...], h1T.astype(jnp.bfloat16),
                  preferred_element_type=jnp.float32)
    h2T = jnp.maximum(h2T + b2_ref[...], 0.0)                        # (64, TB)

    # ---- layer 3: Linear(64 -> 1) as VPU multiply + sublane reduction ----
    v = jnp.sum(h2T * w3_ref[...], axis=0, keepdims=True) + b3_ref[0]  # (1, TB)
    out_ref[...] = v.astype(out_ref.dtype)


def _default_tile_b(B, obs, *, budget_bytes=18 << 20, cap=8192):
    # Rough VMEM bytes per batch column in the feature-major layout:
    #   streamed xT/out double-buffers (sublane-padded) + f32/bf16 intermediates
    #   (h1T f32 + bf16 copy, h2T f32, small temps).
    per_col = 2 * 4 * (max(obs, 8) + 8)                         # xT + out, double-buffered
    per_col += 128 * (4 + 2) + 64 * (4 + 4) + 2 * max(obs, 8)    # h1T/h2T + casts/temps
    t = min(cap, budget_bytes // per_col, _round_up(B, 128))
    return max(128, (int(t) // 128) * 128)


def _batch_dim_semantics():
    # Guarantee the batch grid splits across both TensorCores on v7x;
    # elsewhere plain "parallel" (near-neutral but harmless).
    try:
        kind = jax.devices()[0].device_kind.lower()
    except Exception:
        kind = ""
    return (pltpu.CORE_PARALLEL,) if "v7" in kind else ("parallel",)


def state_value_network(x, params, *, tile_b=None, l1_mxu_min_obs=8):
    """Forward pass of the 3-layer value MLP.  x: [B, obs] f32 -> [B, 1] f32.

    Tail-tile correctness relies on every batch row being independent (padded
    lanes read garbage that the masked boundary store drops).
    """
    w1, b1, w2, b2, w3, b3 = params
    B, obs = x.shape
    hidden1 = w1.shape[1]   # 128
    hidden2 = w2.shape[1]   # 64

    # One-time wrapper-side transposes / casts (feature-major, lane-dense operands).
    xT = jnp.asarray(x, jnp.float32).T                               # (obs, B)
    l1_use_mxu = obs >= l1_mxu_min_obs
    w1T = jnp.asarray(w1, jnp.float32).T                             # (128, obs)
    if l1_use_mxu:
        w1T = w1T.astype(jnp.bfloat16)        # resident MXU operand, cast once here
    b1c = jnp.asarray(b1, jnp.float32).reshape(hidden1, 1)
    w2T = jnp.asarray(w2, jnp.float32).T.astype(jnp.bfloat16)        # (64, 128)
    b2c = jnp.asarray(b2, jnp.float32).reshape(hidden2, 1)
    w3c = jnp.asarray(w3, jnp.float32).reshape(hidden2, 1)
    b3s = jnp.asarray(b3, jnp.float32).reshape(1)                    # SMEM scalar

    # Batch tile is the lane dimension -> multiple of 128; adaptive default
    # amortizes per-grid-step overhead while staying inside the VMEM budget.
    if tile_b is None:
        tile_b = _default_tile_b(B, obs)
    tile_b = min(_round_up(max(int(tile_b), 1), 128), _round_up(B, 128))
    grid = (pl.cdiv(B, tile_b),)

    resident = lambda i: (0, 0)   # weights/biases: same block every grid step

    grid_spec = pltpu.PrefetchScalarGridSpec(
        num_scalar_prefetch=0,
        grid=grid,
        in_specs=[
            pl.BlockSpec((obs, tile_b), lambda i: (0, i)),          # xT (streamed)
            pl.BlockSpec((hidden1, obs), resident),                 # w1T
            pl.BlockSpec((hidden1, 1), resident),                   # b1
            pl.BlockSpec((hidden2, hidden1), resident),             # w2T (bf16)
            pl.BlockSpec((hidden2, 1), resident),                   # b2
            pl.BlockSpec((hidden2, 1), resident),                   # w3
            pl.BlockSpec(memory_space=pltpu.MemorySpace.SMEM),      # b3 scalar
        ],
        out_specs=pl.BlockSpec((1, tile_b), lambda i: (0, i)),      # lane-dense out
    )

    out_row = pl.pallas_call(
        functools.partial(_mlp_kernel, l1_use_mxu=l1_use_mxu),
        out_shape=jax.ShapeDtypeStruct((1, B), jnp.float32),
        grid_spec=grid_spec,
        compiler_params=pltpu.CompilerParams(
            dimension_semantics=_batch_dim_semantics(),
            vmem_limit_bytes=32 * 1024 * 1024,
        ),
    )(xT, w1T, b1c, w2T, b2c, w3c, b3s)

    # (1, B) -> (B, 1): same row-major data order, cheap reshape.
    return out_row.reshape(B, 1)


def init_params(key, observation_space):
    """Deterministic init mimicking nn.Linear (weights stored as [in, out])."""
    k1, k2, k3, k4, k5, k6 = jax.random.split(key, 6)

    def lin(kw, kb, fan_in, fan_out):
        bound = 1.0 / jnp.sqrt(fan_in)
        w = jax.random.uniform(kw, (fan_in, fan_out), jnp.float32, -bound, bound)
        b = jax.random.uniform(kb, (1, fan_out), jnp.float32, -bound, bound)
        return w, b

    w1, b1 = lin(k1, k2, observation_space, 128)
    w2, b2 = lin(k3, k4, 128, 64)
    w3, b3 = lin(k5, k6, 64, 1)
    return (w1, b1, w2, b2, w3, b3)


def state_value_network_ref(x, params):
    w1, b1, w2, b2, w3, b3 = params
    h1 = jnp.maximum(x @ w1 + b1, 0.0)
    h2 = jnp.maximum(h1 @ w2 + b2, 0.0)
    return h2 @ w3 + b3


if __name__ == "__main__":
    key = jax.random.PRNGKey(0)
    kx, kp = jax.random.split(key)

    batch = 8
    observation_space = 4  # e.g. CartPole-style observation

    x = jax.random.normal(kx, (batch, observation_space), dtype=jnp.float32)
    params = init_params(kp, observation_space)

    out = jax.block_until_ready(state_value_network(x, params))
    ref = state_value_network_ref(x, params)
    assert out.shape == (batch, 1)
    # Layer-2 matmul uses bf16 operands (f32 accumulation) -> loose tolerance vs f32 ref.
    assert jnp.allclose(out, ref, atol=3e-2, rtol=3e-2), float(jnp.max(jnp.abs(out - ref)))

    # Multi-tile, non-128-aligned batch (tail tile) + explicit tile override
    # (tile_b gets rounded up to a multiple of 128 internally).
    x_big = jax.random.normal(kx, (1000, observation_space), dtype=jnp.float32)
    out_big = jax.block_until_ready(state_value_network(x_big, params, tile_b=256))
    ref_big = state_value_network_ref(x_big, params)
    assert out_big.shape == (1000, 1)
    assert jnp.allclose(out_big, ref_big, atol=3e-2, rtol=3e-2)

    # Larger observation -> layer 1 routed through the bf16 MXU path.
    obs2 = 40
    params2 = init_params(jax.random.PRNGKey(1), obs2)
    x2 = jax.random.normal(kx, (300, obs2), dtype=jnp.float32)
    out2 = jax.block_until_ready(state_value_network(x2, params2))
    ref2 = state_value_network_ref(x2, params2)
    assert out2.shape == (300, 1)
    assert jnp.allclose(out2, ref2, atol=5e-2, rtol=5e-2), float(jnp.max(jnp.abs(out2 - ref2)))

    print("KERNEL_OK")
</pallas_src>

<mosaic_0001>
module attributes {stable_mosaic.version = 11 : i64} {
  func.func @_mlp_kernel(%arg0: i32, %arg1: memref<4x128xf32, #tpu.memory_space<vmem>>, %arg2: memref<128x4xf32, #tpu.memory_space<vmem>>, %arg3: memref<128x1xf32, #tpu.memory_space<vmem>>, %arg4: memref<64x128xbf16, #tpu.memory_space<vmem>>, %arg5: memref<64x1xf32, #tpu.memory_space<vmem>>, %arg6: memref<64x1xf32, #tpu.memory_space<vmem>>, %arg7: memref<1xf32, #tpu.memory_space<smem>>, %arg8: memref<1x128xf32, #tpu.memory_space<vmem>>) attributes {dimension_semantics = [#tpu.dimension_semantics<parallel>], iteration_bounds = array<i64: 1>, scalar_prefetch = 0 : i64, scratch_operands = 0 : i64, tpu.core_type = #tpu.core_type<tc>, window_params = [{transform_indices = @transform_0, window_bounds = array<i64: 4, 128>}, {pipeline_mode = #tpu.pipeline_mode<synchronous>, transform_indices = @transform_1, window_bounds = array<i64: 128, 4>}, {pipeline_mode = #tpu.pipeline_mode<synchronous>, transform_indices = @transform_2, window_bounds = array<i64: 128, 1>}, {pipeline_mode = #tpu.pipeline_mode<synchronous>, transform_indices = @transform_3, window_bounds = array<i64: 64, 128>}, {pipeline_mode = #tpu.pipeline_mode<synchronous>, transform_indices = @transform_4, window_bounds = array<i64: 64, 1>}, {pipeline_mode = #tpu.pipeline_mode<synchronous>, transform_indices = @transform_5, window_bounds = array<i64: 64, 1>}, {transform_indices = @transform_6, window_bounds = array<i64: 1>}, {transform_indices = @transform_7, window_bounds = array<i64: 1, 128>}]} {
    %c0 = arith.constant 0 : index
    %c0_0 = arith.constant 0 : index
    %0 = vector.load %arg1[%c0, %c0_0] : memref<4x128xf32, #tpu.memory_space<vmem>>, vector<4x128xf32>
    %c0_1 = arith.constant 0 : index
    %c0_2 = arith.constant 0 : index
    %1 = vector.load %arg2[%c0_1, %c0_2] : memref<128x4xf32, #tpu.memory_space<vmem>>, vector<128x4xf32>
    %2 = vector.extract_strided_slice %1 {offsets = [0, 0], sizes = [128, 1], strides = [1, 1]} : vector<128x4xf32> to vector<128x1xf32>
    %3 = vector.extract_strided_slice %0 {offsets = [0, 0], sizes = [1, 128], strides = [1, 1]} : vector<4x128xf32> to vector<1x128xf32>
    %4 = vector.broadcast %2 : vector<128x1xf32> to vector<128x128xf32>
    %5 = vector.broadcast %3 : vector<1x128xf32> to vector<128x128xf32>
    %6 = arith.mulf %4, %5 : vector<128x128xf32>
    %7 = vector.extract_strided_slice %1 {offsets = [0, 1], sizes = [128, 1], strides = [1, 1]} : vector<128x4xf32> to vector<128x1xf32>
    %8 = vector.extract_strided_slice %0 {offsets = [1, 0], sizes = [1, 128], strides = [1, 1]} : vector<4x128xf32> to vector<1x128xf32>
    %9 = vector.broadcast %7 : vector<128x1xf32> to vector<128x128xf32>
    %10 = vector.broadcast %8 : vector<1x128xf32> to vector<128x128xf32>
    %11 = arith.mulf %9, %10 : vector<128x128xf32>
    %12 = arith.addf %6, %11 : vector<128x128xf32>
    %13 = vector.extract_strided_slice %1 {offsets = [0, 2], sizes = [128, 1], strides = [1, 1]} : vector<128x4xf32> to vector<128x1xf32>
    %14 = vector.extract_strided_slice %0 {offsets = [2, 0], sizes = [1, 128], strides = [1, 1]} : vector<4x128xf32> to vector<1x128xf32>
    %15 = vector.broadcast %13 : vector<128x1xf32> to vector<128x128xf32>
    %16 = vector.broadcast %14 : vector<1x128xf32> to vector<128x128xf32>
    %17 = arith.mulf %15, %16 : vector<128x128xf32>
    %18 = arith.addf %12, %17 : vector<128x128xf32>
    %19 = vector.extract_strided_slice %1 {offsets = [0, 3], sizes = [128, 1], strides = [1, 1]} : vector<128x4xf32> to vector<128x1xf32>
    %20 = vector.extract_strided_slice %0 {offsets = [3, 0], sizes = [1, 128], strides = [1, 1]} : vector<4x128xf32> to vector<1x128xf32>
    %21 = vector.broadcast %19 : vector<128x1xf32> to vector<128x128xf32>
    %22 = vector.broadcast %20 : vector<1x128xf32> to vector<128x128xf32>
    %23 = arith.mulf %21, %22 : vector<128x128xf32>
    %24 = arith.addf %18, %23 : vector<128x128xf32>
    %c0_3 = arith.constant 0 : index
    %c0_4 = arith.constant 0 : index
    %25 = vector.load %arg3[%c0_3, %c0_4] : memref<128x1xf32, #tpu.memory_space<vmem>>, vector<128x1xf32>
    %26 = vector.broadcast %25 : vector<128x1xf32> to vector<128x128xf32>
    %27 = arith.addf %24, %26 : vector<128x128xf32>
    %cst = arith.constant 0.000000e+00 : f32
    %28 = vector.broadcast %cst : f32 to vector<128x128xf32>
    %29 = arith.maximumf %27, %28 : vector<128x128xf32>
    %c0_5 = arith.constant 0 : index
    %c0_6 = arith.constant 0 : index
    %30 = vector.load %arg4[%c0_5, %c0_6] : memref<64x128xbf16, #tpu.memory_space<vmem>>, vector<64x128xbf16>
    %31 = arith.truncf %29 : vector<128x128xf32> to vector<128x128xbf16>
    %cst_7 = arith.constant dense<0.000000e+00> : vector<64x128xf32>
    %32 = tpu.matmul %30, %31, %cst_7 {dimension_numbers = #tpu.dot_dimension_numbers<[1], [0], [0], [1], [0, 0, 1, 1], [], []>} : vector<64x128xbf16>, vector<128x128xbf16>, vector<64x128xf32> -> vector<64x128xf32>
    %c0_8 = arith.constant 0 : index
    %c0_9 = arith.constant 0 : index
    %33 = vector.load %arg5[%c0_8, %c0_9] : memref<64x1xf32, #tpu.memory_space<vmem>>, vector<64x1xf32>
    %34 = vector.broadcast %33 : vector<64x1xf32> to vector<64x128xf32>
    %35 = arith.addf %32, %34 : vector<64x128xf32>
    %cst_10 = arith.constant 0.000000e+00 : f32
    %36 = vector.broadcast %cst_10 : f32 to vector<64x128xf32>
    %37 = arith.maximumf %35, %36 : vector<64x128xf32>
    %c0_11 = arith.constant 0 : index
    %c0_12 = arith.constant 0 : index
    %38 = vector.load %arg6[%c0_11, %c0_12] : memref<64x1xf32, #tpu.memory_space<vmem>>, vector<64x1xf32>
    %39 = vector.broadcast %38 : vector<64x1xf32> to vector<64x128xf32>
    %40 = arith.mulf %37, %39 : vector<64x128xf32>
    %cst_13 = arith.constant dense<0.000000e+00> : vector<128xf32>
    %41 = vector.multi_reduction <add>, %40, %cst_13 [0] : vector<64x128xf32> to vector<128xf32>
    %42 = vector.shape_cast %41 : vector<128xf32> to vector<1x128xf32>
    %c0_14 = arith.constant 0 : index
    %43 = memref.load %arg7[%c0_14] : memref<1xf32, #tpu.memory_space<smem>>
    %44 = vector.broadcast %43 : f32 to vector<1x128xf32>
    %45 = arith.addf %42, %44 : vector<1x128xf32>
    %c0_15 = arith.constant 0 : index
    %c0_16 = arith.constant 0 : index
    %46 = vector.load %arg8[%c0_15, %c0_16] : memref<1x128xf32, #tpu.memory_space<vmem>>, vector<1x128xf32>
    tpu.vector_store %arg8[%c0_15, %c0_16], %45 {strides = array<i32>} : memref<1x128xf32, #tpu.memory_space<vmem>>, vector<1x128xf32>,
    return
  }
  func.func @transform_0(%arg0: i32) -> (i32, i32) {
    %c0_i32 = arith.constant 0 : i32
    %c0_i32_0 = arith.constant 0 : i32
    return %c0_i32, %arg0 : i32, i32
  }
  func.func @transform_1(%arg0: i32) -> (i32, i32) {
    %c0_i32 = arith.constant 0 : i32
    %c0_i32_0 = arith.constant 0 : i32
    %c0_i32_1 = arith.constant 0 : i32
    return %c0_i32, %c0_i32_0 : i32, i32
  }
  func.func @transform_2(%arg0: i32) -> (i32, i32) {
    %c0_i32 = arith.constant 0 : i32
    %c0_i32_0 = arith.constant 0 : i32
    %c0_i32_1 = arith.constant 0 : i32
    return %c0_i32, %c0_i32_0 : i32, i32
  }
  func.func @transform_3(%arg0: i32) -> (i32, i32) {
    %c0_i32 = arith.constant 0 : i32
    %c0_i32_0 = arith.constant 0 : i32
    %c0_i32_1 = arith.constant 0 : i32
    return %c0_i32, %c0_i32_0 : i32, i32
  }
  func.func @transform_4(%arg0: i32) -> (i32, i32) {
    %c0_i32 = arith.constant 0 : i32
    %c0_i32_0 = arith.constant 0 : i32
    %c0_i32_1 = arith.constant 0 : i32
    return %c0_i32, %c0_i32_0 : i32, i32
  }
  func.func @transform_5(%arg0: i32) -> (i32, i32) {
    %c0_i32 = arith.constant 0 : i32
    %c0_i32_0 = arith.constant 0 : i32
    %c0_i32_1 = arith.constant 0 : i32
    return %c0_i32, %c0_i32_0 : i32, i32
  }
  func.func @transform_6(%arg0: i32) -> i32 {
    %c0_i32 = arith.constant 0 : i32
    %c0_i32_0 = arith.constant 0 : i32
    return %c0_i32 : i32
  }
  func.func @transform_7(%arg0: i32) -> (i32, i32) {
    %c0_i32 = arith.constant 0 : i32
    %c0_i32_0 = arith.constant 0 : i32
    return %c0_i32, %arg0 : i32, i32
  }
}

</mosaic_0001>

<bundles_post_ra>
// kernel: tpu_custom_call.1
= control target key start
LH: loop header
LB: loop body
LE: loop exit
PB: predicated region body
PF: predicated region fallthrough
CT: control target
= control target key end

     0   :  { %v953_v2 = vmov 0   ;;  %s1430_s0 = inlined_call_operand.vmem [shape: f32[4,8], index: 0, kind: input, shape index: {}]   ;;  %s1431_s1 = inlined_call_operand.vmem [shape: f32[128,4], index: 1, kind: input, shape index: {}]   ;;  %s1432_s2 = inlined_call_operand.vmem [shape: f32[128,1], index: 2, kind: input, shape index: {}]   ;;  %s1433_s3 = inlined_call_operand.vmem [shape: bf16[64,128], index: 3, kind: input, shape index: {}]   ;;  %s1434_s4 = inlined_call_operand.vmem [shape: f32[64,1], index: 4, kind: input, shape index: {}]   ;;  %s1435_s5 = inlined_call_operand.vmem [shape: f32[64,1], index: 5, kind: input, shape index: {}]   ;;  %s1436_s6 = inlined_call_operand.<no memory space> [shape: f32[1], index: 6, kind: input, shape index: {}]   ;;  %s1437_s7 = inlined_call_operand.hbm [shape: f32[1,8], index: 7, kind: output, shape index: {}]  }
   0x1   :  { %v1001_v0 = vld [vmem:[%s1431_s1 + $0x10] sm:$0xff]  ;;  %v1006_v1 = vld [vmem:[%s1431_s1] sm:$0xff]  ;;  %884 = vset.pattern.permute.xlu1 %v953_v2  ;;  %883 = vset.pattern.permute.xlu0 %v953_v2  ;;  %v33_v3 = vld [vmem:[%s1431_s1 + $0x18] sm:$0xff] }
   0x2   :  { %58 = vperm.xlu1 %884, %v1001_v0   ;;  %48 = vperm.xlu0 %883, %v1006_v1   ;;  %v31_v4 = vld [vmem:[%s1431_s1 + $0x8] sm:$0xff]  ;;  %v34_v6 = vld [vmem:[%s1431_s1 + $0x20] sm:$0xff] }
   0x3   :  { %v1021_v5 = vld [vmem:[%s1431_s1 + $0x28] sm:$0xff] }
   0x6   :  { %63 = vperm.xlu1 %884, %v33_v3   ;;  %53 = vperm.xlu0 %883, %v31_v4  }
   0xa   :  { %73 = vperm.xlu1 %884, %v1021_v5   ;;  %68 = vperm.xlu0 %883, %v34_v6  }
   0xb   :  { %13 = vsyncpa [#allocation4], 0  ;;  %v447_v7 = vld [vmem:[%s1432_s2 + $0x8] sm:$0xff]  ;;  %v954_v8 = vmov 1   ;;  %v1034_v9 = vld [vmem:[%s1431_s1 + $0x30] sm:$0xff]  ;;  %v955_v10 = vmov 2   ;;  %v126_v55 = vlaneseq }
   0xc   :  { %v1041_v11 = vld [vmem:[%s1431_s1 + $0x48] sm:$0xff]  ;;  %v40_v13 = vld [vmem:[%s1431_s1 + $0x50] sm:$0xff]  ;;  %v956_v15 = vmov 3   ;;  %v446_v18 = vld [vmem:[%s1432_s2] sm:$0xff]  ;;  %s957_s9 = smov [#allocation3]  }
   0xd   :  { %v451_v12 = vld [vmem:[%s1432_s2 + $0x28] sm:$0xff]  ;;  %v1068_v17 = vld [vmem:[%s1431_s1 + $0x70] sm:$0xff]  ;;  %v37_v19 = vld [vmem:[%s1431_s1 + $0x38] sm:$0xff]  ;;  %v127_v58 = vshrl.u32 %v126_v55, 7  ;;  %s814_s10 = sshll.u32 %s957_s9, 4  ;;  %s815_s10 = int_to_ptr.vmem [resolvable:$true] %s814_s10 }
   0xe   :  { %885 = vset.pattern.permute.xlu1 %v954_v8  ;;  %469 = vperm.xlu0 %883, %v447_v7   ;;  %v1056_v14 = vld [vmem:[%s1431_s1 + $0x68] sm:$0xff]  ;;  %v448_v20 = vld [vmem:[%s1432_s2 + $0x10] sm:$0xff]  ;;  %v449_v21 = vld [vmem:[%s1432_s2 + $0x18] sm:$0xff]  ;;  %s929_s11 = scalar_lea.vmem %s815_s10, 16  ;;  %p934_p1 = scmp.lt.s32.totalorder %s815_s10, %s815_s10 }
   0xf   :  { %151 = vperm.xlu1 %885, %v31_v4   ;;  %v455_v16 = vld [vmem:[%s1432_s2 + $0x48] sm:$0xff]  ;;  %v38_v22 = vld [vmem:[%s1431_s1 + $0x40] sm:$0xff]  ;;  %v1117_v23 = vld [vmem:[%s1431_s1 + $0x78] sm:$0xff]  ;;  %v128_v60 = vsub.s32 0, %v127_v58  ;;  %v212_v63 = vsub.s32 1, %v127_v58  ;;  %p930_p0 = scmp.ne.s32.totalorder %s815_s10, %s929_s11 }
  0x10   :  { %v460_v24 = vld [vmem:[%s1432_s2 + $0x70] sm:$0xff]  ;;  %v450_v25 = vld [vmem:[%s1432_s2 + $0x20] sm:$0xff]  ;;  %v591_v26 = vld [vmem:[%s1434_s4 + $0x8] sm:$0xff] }
  0x11   :  { %v593_v27 = vld [vmem:[%s1434_s4 + $0x18] sm:$0xff]  ;;  %v736_v28 = vld [vmem:[%s1435_s5 + $0x8] sm:$0xff]  ;;  %v737_v32 = vld [vmem:[%s1435_s5 + $0x10] sm:$0xff] }
  0x12   :  { %78 = vperm.xlu0 %883, %v1034_v9   ;;  %v41_v31 = vld [vmem:[%s1431_s1 + $0x58] sm:$0xff]  ;;  %v739_v38 = vld [vmem:[%s1435_s5 + $0x20] sm:$0xff]  ;;  %v740_v41 = vld [vmem:[%s1435_s5 + $0x28] sm:$0xff] }
  0x13   :  { %886 = vset.pattern.permute.xlu1 %v955_v10  ;;  %v738_v35 = vld [vmem:[%s1435_s5 + $0x18] sm:$0xff]  ;;  %v452_v43 = vld [vmem:[%s1432_s2 + $0x30] sm:$0xff]  ;;  %v1198_v52 = vld [vmem:[%s1431_s1 + $0x60] sm:$0xff] }
  0x14   :  { %247 = vperm.xlu1 %886, %v1006_v1   ;;  %v742_v45 = vld [vmem:[%s1435_s5 + $0x38] sm:$0xff]  ;;  %v29_v62 = vld [vmem:[%s1430_s0] sm:$0xf] }
  0x15   :  { %v453_v47 = vld [vmem:[%s1432_s2 + $0x38] sm:$0xff] }
  0x16   :  { %93 = vperm.xlu0 %883, %v1041_v11  }
  0x18   :  { %887 = vset.pattern.permute.xlu1 %v954_v8 }
  0x19   :  { %155 = vperm.xlu1 %887, %v1001_v0  }
  0x1a   :  { %489 = vperm.xlu0 %883, %v451_v12  }
  0x1d   :  { %159 = vperm.xlu1 %887, %v33_v3  }
  0x1e   :  { %98 = vperm.xlu0 %883, %v40_v13  }
  0x21   :  { %888 = vset.pattern.permute.xlu1 %v956_v15 }
  0x22   :  { %351 = vperm.xlu1 %888, %v31_v4   ;;  %113 = vperm.xlu0 %883, %v1056_v14  }
  0x26   :  { %889 = vset.pattern.permute.xlu1 %v955_v10  ;;  %509 = vperm.xlu0 %883, %v455_v16  }
  0x27   :  { %255 = vperm.xlu1 %889, %v1001_v0  }
  0x2a   :  { %118 = vperm.xlu0 %883, %v1068_v17  }
  0x2b   :  { %890 = vset.pattern.permute.xlu1 %v954_v8 }
  0x2c   :  { %163 = vperm.xlu1 %890, %v34_v6  }
  0x2e   :  { %914 = vset.pattern.permute.xlu0 %v954_v8 }
  0x2f   :  { %147 = vperm.xlu0 %914, %v1006_v1  }
  0x30   :  { %167 = vperm.xlu1 %890, %v1021_v5  }
  0x33   :  { %171 = vperm.xlu0 %914, %v1034_v9  }
  0x34   :  { %891 = vset.pattern.permute.xlu1 %v956_v15 }
  0x35   :  { %359 = vperm.xlu1 %891, %v33_v3  }
  0x37   :  { %187 = vperm.xlu0 %914, %v40_v13  }
  0x39   :  { %892 = vset.pattern.permute.xlu1 %v953_v2 }
  0x3a   :  { %464 = vperm.xlu1 %892, %v446_v18  }
  0x3b   :  { %203 = vperm.xlu0 %914, %v1068_v17  }
  0x3e   :  { %893 = vset.pattern.permute.xlu1 %v955_v10 }
  0x3f   :  { %263 = vperm.xlu1 %893, %v34_v6   ;;  %916 = vset.pattern.permute.xlu0 %v955_v10 }
  0x40   :  { %251 = vperm.xlu0 %916, %v31_v4   ;;  %v1221_v4 = vrot.slane %v29_v62, %v212_v63 }
  0x43   :  { %267 = vperm.xlu1 %893, %v1021_v5  }
  0x44   :  { %259 = vperm.xlu0 %916, %v33_v3  }
  0x47   :  { %894 = vset.pattern.permute.xlu1 %v953_v2 }
  0x48   :  { %83 = vperm.xlu1 %894, %v37_v19   ;;  %271 = vperm.xlu0 %916, %v1034_v9  }
  0x4c   :  { %895 = vset.pattern.permute.xlu1 %v954_v8  ;;  %287 = vperm.xlu0 %916, %v40_v13  }
  0x4d   :  { %175 = vperm.xlu1 %895, %v37_v19  }
  0x50   :  { %303 = vperm.xlu0 %916, %v1068_v17  }
  0x51   :  { %896 = vset.pattern.permute.xlu1 %v956_v15 }
  0x52   :  { %363 = vperm.xlu1 %896, %v34_v6  }
  0x54   :  { %920 = vset.pattern.permute.xlu0 %v956_v15 }
  0x55   :  { %347 = vperm.xlu0 %920, %v1006_v1   ;;  %v1216_v1 = vrot.slane %v29_v62, %v128_v60 }
  0x56   :  { %897 = vset.pattern.permute.xlu1 %v953_v2 }
  0x57   :  { %474 = vperm.xlu1 %897, %v448_v20  }
  0x59   :  { %355 = vperm.xlu0 %920, %v1001_v0  }
  0x5b   :  { %479 = vperm.xlu1 %897, %v449_v21  }
  0x5d   :  { %367 = vperm.xlu0 %920, %v1021_v5  }
  0x5f   :  { %898 = vset.pattern.permute.xlu1 %v955_v10 }
  0x60   :  { %275 = vperm.xlu1 %898, %v37_v19  }
  0x61   :  { %371 = vperm.xlu0 %920, %v1034_v9   ;;  %v454_v9 = vld [vmem:[%s1432_s2 + $0x40] sm:$0xff] }
  0x64   :  { %899 = vset.pattern.permute.xlu1 %v953_v2 }
  0x65   :  { %88 = vperm.xlu1 %899, %v38_v22   ;;  %383 = vperm.xlu0 %920, %v1041_v11  }
  0x69   :  { %900 = vset.pattern.permute.xlu1 %v954_v8  ;;  %387 = vperm.xlu0 %920, %v40_v13  }
  0x6a   :  { %179 = vperm.xlu1 %900, %v38_v22  }
  0x6d   :  { %399 = vperm.xlu0 %920, %v1056_v14  }
  0x6e   :  { %183 = vperm.xlu1 %900, %v1041_v11  }
  0x71   :  { %407 = vperm.xlu0 %920, %v1117_v23  }
  0x72   :  { %901 = vset.pattern.permute.xlu1 %v956_v15 }
  0x73   :  { %375 = vperm.xlu1 %901, %v37_v19  }
  0x75   :  { %924 = vset.pattern.permute.xlu0 %v953_v2 }
  0x76   :  { %534 = vperm.xlu0 %924, %v460_v24   ;;  %v412_v24 = vsub.s32 3, %v127_v58 }
  0x77   :  { %902 = vset.pattern.permute.xlu1 %v953_v2 }
  0x78   :  { %484 = vperm.xlu1 %902, %v450_v25  }
  0x7a   :  { %605 = vperm.xlu0 %924, %v591_v26  }
  0x7c   :  { %903 = vset.pattern.permute.xlu1 %v955_v10 }
  0x7d   :  { %279 = vperm.xlu1 %903, %v38_v22  }
  0x7e   :  { %615 = vperm.xlu0 %924, %v593_v27  }
  0x81   :  { %v1139_v29 = vpop.permute.xlu1 %58  ;;  %283 = vperm.xlu1 %903, %v1041_v11   ;;  %v1142_v30 = vpop.permute.xlu0 %48 }
  0x82   :  { %750 = vperm.xlu0 %924, %v736_v28  }
  0x85   :  { %v1150_v33 = vpop.permute.xlu1 %63  ;;  %904 = vset.pattern.permute.xlu1 %v953_v2  ;;  %v1153_v34 = vpop.permute.xlu0 %53 }
  0x86   :  { %103 = vperm.xlu1 %904, %v41_v31   ;;  %755 = vperm.xlu0 %924, %v737_v32   ;;  %v131_v27 = vmul.f32 %v1216_v1, %v1153_v34 }
  0x89   :  { %v1158_v36 = vpop.permute.xlu1 %73  ;;  %v1160_v37 = vpop.permute.xlu0 %68 }
  0x8a   :  { %905 = vset.pattern.permute.xlu1 %v954_v8  ;;  %760 = vperm.xlu0 %924, %v738_v35   ;;  %v1245_v35 = vrot.slane %v29_v62, %v412_v24 }
  0x8b   :  { %191 = vperm.xlu1 %905, %v41_v31  }
  0x8d   :  { %v1166_v39 = vpop.permute.xlu0 %469 }
  0x8e   :  { %v1168_v40 = vpop.permute.xlu1 %151  ;;  %765 = vperm.xlu0 %924, %v739_v38  }
  0x8f   :  { %906 = vset.pattern.permute.xlu1 %v956_v15  ;;  %v215_v28 = vmul.f32 %v1221_v4, %v1168_v40 }
  0x90   :  { %379 = vperm.xlu1 %906, %v38_v22   ;;  %v312_v22 = vsub.s32 2, %v127_v58 }
  0x91   :  { %v79_v42 = vpop.permute.xlu0 %78 }
  0x92   :  { %770 = vperm.xlu0 %924, %v740_v41   ;;  %v136_v5 = vmul.f32 %v1216_v1, %v79_v42  ;;  %v1243_v32 = vrot.slane %v29_v62, %v312_v22  ;;  %v231_v42 = vadd.f32 %v215_v28, %v131_v27 }
  0x93   :  { %v1177_v44 = vpop.permute.xlu1 %247 }
  0x94   :  { %907 = vset.pattern.permute.xlu1 %v953_v2 }
  0x95   :  { %494 = vperm.xlu1 %907, %v452_v43   ;;  %v1183_v46 = vpop.permute.xlu0 %93 }
  0x96   :  { %780 = vperm.xlu0 %924, %v742_v45  }
  0x98   :  { %v1188_v48 = vpop.permute.xlu1 %155 }
  0x99   :  { %499 = vperm.xlu1 %907, %v453_v47   ;;  %v1190_v49 = vpop.permute.xlu0 %489  ;;  %v216_v22 = vmul.f32 %v1221_v4, %v1188_v48 }
  0x9c   :  { %v1192_v50 = vpop.permute.xlu1 %159 }
  0x9d   :  { %908 = vset.pattern.permute.xlu1 %v955_v10  ;;  %v99_v51 = vpop.permute.xlu0 %98 }
  0x9e   :  { %291 = vperm.xlu1 %908, %v41_v31   ;;  %v140_v12 = vmul.f32 %v1216_v1, %v99_v51 }
  0xa1   :  { %v352_v53 = vpop.permute.xlu1 %351  ;;  %v1200_v54 = vpop.permute.xlu0 %113 }
  0xa2   :  { %909 = vset.pattern.permute.xlu1 %v953_v2  ;;  %v415_v45 = vmul.f32 %v1245_v35, %v352_v53 }
  0xa3   :  { %108 = vperm.xlu1 %909, %v1198_v52  }
  0xa5   :  { %v1204_v56 = vpop.permute.xlu0 %509 }
  0xa6   :  { %v1206_v57 = vpop.permute.xlu1 %255 }
  0xa7   :  { %910 = vset.pattern.permute.xlu1 %v954_v8  ;;  %v316_v27 = vmul.f32 %v1243_v32, %v1206_v57 }
  0xa8   :  { %195 = vperm.xlu1 %910, %v1198_v52  }
  0xa9   :  { %v119_v59 = vpop.permute.xlu0 %118 }
  0xaa   :  { %v144_v19 = vmul.f32 %v1216_v1, %v119_v59 }
  0xab   :  { %v1210_v61 = vpop.permute.xlu1 %163 }
  0xac   :  { %199 = vperm.xlu1 %910, %v1056_v14  }
  0xae   :  { %v148_v0 = vpop.permute.xlu0 %147 }
  0xaf   :  { %v1218_v3 = vpop.permute.xlu1 %167 }
  0xb0   :  { %911 = vset.pattern.permute.xlu1 %v956_v15 }
  0xb1   :  { %391 = vperm.xlu1 %911, %v41_v31  }
  0xb2   :  { %v172_v6 = vpop.permute.xlu0 %171 }
  0xb3   :  { %v220_v7 = vmul.f32 %v1221_v4, %v172_v6  ;;  %v214_v6 = vmul.f32 %v1221_v4, %v148_v0  ;;  %v456_v0 = vld [vmem:[%s1432_s2 + $0x50] sm:$0xff] }
  0xb4   :  { %v1228_v11 = vpop.permute.xlu1 %359 }
  0xb5   :  { %v236_v13 = vadd.f32 %v220_v7, %v136_v5  ;;  %912 = vset.pattern.permute.xlu1 %v953_v2  ;;  %v130_v5 = vmul.f32 %v1216_v1, %v1142_v30  ;;  %v417_v48 = vmul.f32 %v1245_v35, %v1228_v11 }
  0xb6   :  { %504 = vperm.xlu1 %912, %v454_v9   ;;  %v188_v16 = vpop.permute.xlu0 %187  ;;  %v217_v9 = vmul.f32 %v1221_v4, %v1192_v50  ;;  %v314_v50 = vmul.f32 %v1243_v32, %v1177_v44 }
  0xb7   :  { %v224_v18 = vmul.f32 %v1221_v4, %v188_v16  ;;  %v133_v16 = vmul.f32 %v1216_v1, %v1150_v33  ;;  %v132_v33 = vmul.f32 %v1216_v1, %v1139_v29 }
  0xb9   :  { %v240_v20 = vadd.f32 %v224_v18, %v140_v12  ;;  %v1234_v21 = vpop.permute.xlu1 %464  ;;  %v230_v18 = vadd.f32 %v214_v6, %v130_v5  ;;  %v233_v24 = vadd.f32 %v217_v9, %v133_v16 }
  0xba   :  { %913 = vset.pattern.permute.xlu1 %v955_v10  ;;  %v204_v25 = vpop.permute.xlu0 %203 }
  0xbb   :  { %295 = vperm.xlu1 %913, %v1198_v52   ;;  %v228_v26 = vmul.f32 %v1221_v4, %v204_v25 }
  0xbd   :  { %v244_v31 = vadd.f32 %v228_v26, %v144_v19  ;;  %v457_v26 = vld [vmem:[%s1432_s2 + $0x58] sm:$0xff] }
  0xbe   :  { %v1247_v38 = vpop.permute.xlu1 %263 }
  0xbf   :  { %299 = vperm.xlu1 %913, %v1056_v14   ;;  %v252_v41 = vpop.permute.xlu0 %251 }
  0xc0   :  { %v315_v43 = vmul.f32 %v1243_v32, %v252_v41 }
  0xc2   :  { %v331_v47 = vadd.f32 %v315_v43, %v231_v42  ;;  %v1252_v34 = vpop.permute.xlu1 %267  ;;  %v232_v42 = vadd.f32 %v216_v22, %v132_v33 }
  0xc3   :  { %915 = vset.pattern.permute.xlu1 %v953_v2  ;;  %v260_v40 = vpop.permute.xlu0 %259 }
  0xc4   :  { %v431_v51 = vadd.f32 %v415_v45, %v331_v47  ;;  %123 = vperm.xlu1 %915, %v1117_v23   ;;  %v317_v19 = vmul.f32 %v1243_v32, %v260_v40  ;;  %v332_v45 = vadd.f32 %v316_v27, %v232_v42  ;;  %v925_v27 = vld [vmem:[%s1433_s3] sm:$0xff]  }
  0xc5   :  { %854 = vmatprep.mubr.bf16.mxu0 %v925_v27 }
  0xc6   :  { %v543_v55 = vadd.f32 %v1166_v39, %v431_v51  ;;  %v333_v28 = vadd.f32 %v317_v19, %v233_v24 }
  0xc7   :  { %v84_v58 = vpop.permute.xlu1 %83  ;;  %v272_v59 = vpop.permute.xlu0 %271 }
  0xc8   :  { %917 = vset.pattern.permute.xlu1 %v954_v8  ;;  %v320_v14 = vmul.f32 %v1243_v32, %v272_v59  ;;  %v137_v39 = vmul.f32 %v1216_v1, %v84_v58  ;;  %v433_v51 = vadd.f32 %v417_v48, %v333_v28  ;;  %v559_v57 = vmax.f32 %v543_v55, 0.0 }
  0xc9   :  { %207 = vperm.xlu1 %917, %v1117_v23  }
  0xca   :  { %v1260_v53 = vadd.f32 %v320_v14, %v236_v13 }
  0xcb   :  { %v288_v60 = vpop.permute.xlu0 %287 }
  0xcc   :  { %v176_v62 = vpop.permute.xlu1 %175  ;;  %v324_v63 = vmul.f32 %v1243_v32, %v288_v60 }
  0xcd   :  { %v221_v7 = vmul.f32 %v1221_v4, %v176_v62  ;;  %918 = vset.pattern.permute.xlu1 %v956_v15 }
  0xce   :  { %v1269_v8 = vadd.f32 %v324_v63, %v240_v20  ;;  %395 = vperm.xlu1 %918, %v1198_v52  }
  0xcf   :  { %v1274_v12 = vadd.f32 %v221_v7, %v137_v39  ;;  %v304_v13 = vpop.permute.xlu0 %303 }
  0xd0   :  { %v328_v30 = vmul.f32 %v1243_v32, %v304_v13  ;;  %v461_v13 = vld [vmem:[%s1432_s2 + $0x78] sm:$0xff] }
  0xd1   :  { %v1283_v20 = vpop.permute.xlu1 %363 }
  0xd2   :  { %v1285_v52 = vadd.f32 %v328_v30, %v244_v31  ;;  %919 = vset.pattern.permute.xlu1 %v953_v2  ;;  %v330_v31 = vadd.f32 %v314_v50, %v230_v18  ;;  %v319_v30 = vmul.f32 %v1243_v32, %v1252_v34  ;;  %v218_v18 = vmul.f32 %v1221_v4, %v1210_v61  ;;  %v592_v61 = vld [vmem:[%s1434_s4 + $0x10] sm:$0xff] }
  0xd3   :  { %514 = vperm.xlu1 %919, %v456_v0   ;;  %v318_v34 = vmul.f32 %v1243_v32, %v1247_v38  ;;  %v418_v33 = vmul.f32 %v1245_v35, %v1283_v20  ;;  %v926_v38 = vld [vmem:[%s1433_s3 + $0x10] sm:$0xff]  }
  0xd4   :  { %v348_v25 = vpop.permute.xlu0 %347  ;;  %858 = vmatprep.mubr.bf16.mxu1 %v926_v38 }
  0xd5   :  { %v414_v44 = vmul.f32 %v1245_v35, %v348_v25 }
  0xd6   :  { %v475_v41 = vpop.permute.xlu1 %474 }
  0xd7   :  { %v430_v43 = vadd.f32 %v414_v44, %v330_v31  ;;  %519 = vperm.xlu1 %919, %v457_v26   ;;  %v735_v44 = vld [vmem:[%s1435_s5] sm:$0xff] }
  0xd8   :  { %v356_v29 = vpop.permute.xlu0 %355 }
  0xd9   :  { %v542_v47 = vadd.f32 %v1234_v21, %v430_v43  ;;  %v416_v40 = vmul.f32 %v1245_v35, %v356_v29  ;;  %v594_v43 = vld [vmem:[%s1434_s4 + $0x20] sm:$0xff] }
  0xda   :  { %v480_v58 = vpop.permute.xlu1 %479 }
  0xdb   :  { %v558_v59 = vmax.f32 %v542_v47, 0.0  ;;  %v432_v14 = vadd.f32 %v416_v40, %v332_v45  ;;  %v545_v60 = vadd.f32 %v480_v58, %v433_v51  ;;  %921 = vset.pattern.permute.xlu1 %v955_v10  ;;  %v458_v10 = vld [vmem:[%s1432_s2 + $0x60] sm:$0xff]  ;;  %v596_v40 = vld [vmem:[%s1434_s4 + $0x30] sm:$0xff]  ;;  %v597_v58 = vld [vmem:[%s1434_s4 + $0x38] sm:$0xff] }
  0xdc   :  { %307 = vperm.xlu1 %921, %v1117_v23   ;;  %v368_v9 = vpop.permute.xlu0 %367 }
  0xdd   :  { %v582_v62 = vpack.c.bf16 %v559_v57, %v558_v59  ;;  %v544_v11 = vadd.f32 %v475_v41, %v432_v14  ;;  %v561_v5 = vmax.f32 %v545_v60, 0.0  ;;  %v419_v50 = vmul.f32 %v1245_v35, %v368_v9  ;;  %v741_v60 = vld [vmem:[%s1435_s5 + $0x30] sm:$0xff] }
  0xdf   :  { %v560_v63 = vmax.f32 %v544_v11, 0.0  ;;  %v1306_v6 = vpop.permute.xlu1 %275  ;;  %838 = vmatprep.subr.bf16.mxu0 %v582_v62  ;;  %862 = vmatprep.subr.bf16.mxu1 %v582_v62 }
  0xe0   :  { %922 = vset.pattern.permute.xlu1 %v956_v15  ;;  %839 = vmatpush3.bf16.msra.mxu0 %v582_v62  ;;  %v459_v15 = vld [vmem:[%s1432_s2 + $0x68] sm:$0xff]  ;;  %s933_s2 = scalar_lea.vmem %s815_s10, 32 }
  0xe1   :  { %v583_v21 = vpack.c.bf16 %v561_v5, %v560_v63  ;;  %870 = vmatpush3.bf16.msra.mxu1 %v582_v62  ;;  %403 = vperm.xlu1 %922, %v1068_v17   ;;  %v219_v17 = vmul.f32 %v1221_v4, %v1218_v3  ;;  %v134_v3 = vmul.f32 %v1216_v1, %v1160_v37  ;;  %v372_v63 = vpop.permute.xlu0 %371  ;;  %p935_p2 = scmp.lt.s32.totalorder %s933_s2, %s929_s11 }
  0xe2   :  { %v321_v5 = vmul.f32 %v1243_v32, %v1306_v6 }
  0xe3   :  { %840 = vmatprep.subr.bf16.mxu0 %v583_v21  ;;  %863 = vmatprep.subr.bf16.mxu1 %v583_v21  ;;  %v234_v24 = vadd.f32 %v218_v18, %v134_v3  ;;  %v139_v18 = vmul.f32 %v1216_v1, %v1183_v46  ;;  %p936_p3 = por %p935_p2, %p934_p1 }
  0xe4   :  { %v89_v23 = vpop.permute.xlu1 %88  ;;  %841 = vmatpush3.bf16.msra.mxu0 %v583_v21 }
  0xe5   :  { %871 = vmatpush3.bf16.msra.mxu1 %v583_v21  ;;  %923 = vset.pattern.permute.xlu1 %v953_v2  ;;  %v138_v39 = vmul.f32 %v1216_v1, %v89_v23  ;;  %v135_v2 = vmul.f32 %v1216_v1, %v1158_v36  ;;  %v590_v36 = vld [vmem:[%s1434_s4] sm:$0xff]  ;;  %v334_v26 = vadd.f32 %v318_v34, %v234_v24  ;;  %p937_p4 = pnand %p936_p3, %p930_p0 }
  0xe6   :  { %524 = vperm.xlu1 %923, %v458_v10   ;;  %v420_v21 = vmul.f32 %v1245_v35, %v372_v63 }
  0xe7   :  { %v235_v19 = vadd.f32 %v219_v17, %v135_v2  ;;  %v434_v20 = vadd.f32 %v418_v33, %v334_v26 }
  0xe9   :  { %v180_v55 = vpop.permute.xlu1 %179  ;;  %v335_v22 = vadd.f32 %v319_v30, %v235_v19 }
  0xea   :  { %v222_v7 = vmul.f32 %v1221_v4, %v180_v55  ;;  %529 = vperm.xlu1 %923, %v459_v15   ;;  %v337_v15 = vadd.f32 %v321_v5, %v1274_v12  ;;  %v436_v55 = vadd.f32 %v420_v21, %v1260_v53 }
  0xeb   :  { %v435_v37 = vadd.f32 %v419_v50, %v335_v22 }
  0xec   :  { %v1328_v0 = vadd.f32 %v222_v7, %v138_v39 }
  0xed   :  { %v1330_v16 = vpop.permute.xlu1 %183  ;;  %v547_v28 = vadd.f32 %v1190_v49, %v435_v37  ;;  %v595_v49 = vld [vmem:[%s1434_s4 + $0x28] sm:$0xff] }
  0xee   :  { %539 = vperm.xlu1 %923, %v461_v13   ;;  %v223_v12 = vmul.f32 %v1221_v4, %v1330_v16 }
  0xef   :  { %v563_v48 = vmax.f32 %v547_v28, 0.0 }
  0xf0   :  { %v239_v50 = vadd.f32 %v223_v12, %v139_v18 }
  0xf2   :  { %600 = vperm.xlu1 %923, %v590_v36   ;;  %v376_v25 = vpop.permute.xlu1 %375  ;;  %v384_v36 = vpop.permute.xlu0 %383 }
  0xf3   :  { %v421_v10 = vmul.f32 %v1245_v35, %v376_v25  ;;  %v423_v22 = vmul.f32 %v1245_v35, %v384_v36 }
  0xf5   :  { %v437_v39 = vadd.f32 %v421_v10, %v337_v15  ;;  %v143_v10 = vmul.f32 %v1216_v1, %v1200_v54 }
  0xf6   :  { %610 = vperm.xlu1 %923, %v592_v61  }
  0xf7   :  { %v485_v31 = vpop.permute.xlu1 %484 }
  0xf8   :  { %v546_v41 = vadd.f32 %v485_v31, %v434_v20 }
  0xfa   :  { %v562_v42 = vmax.f32 %v546_v41, 0.0  ;;  %745 = vperm.xlu1 %923, %v735_v44  }
  0xfc   :  { %v584_v29 = vpack.c.bf16 %v563_v48, %v562_v42  ;;  %v280_v45 = vpop.permute.xlu1 %279 }
  0xfd   :  { %v322_v33 = vmul.f32 %v1243_v32, %v280_v45 }
  0xfe   :  { %620 = vperm.xlu1 %923, %v594_v43   ;;  %842 = vmatprep.subr.bf16.mxu0 %v584_v29  ;;  %v388_v43 = vpop.permute.xlu0 %387 }
  0xff   :  { %864 = vmatprep.subr.bf16.mxu1 %v584_v29  ;;  %843 = vmatpush3.bf16.msra.mxu0 %v584_v29  ;;  %v338_v46 = vadd.f32 %v322_v33, %v1328_v0  ;;  %v424_v0 = vmul.f32 %v1245_v35, %v388_v43 }
 0x100   :  { %872 = vmatpush3.bf16.msra.mxu1 %v584_v29  ;;  %v284_v47 = vpop.permute.xlu1 %283 }
 0x101   :  { %v323_v19 = vmul.f32 %v1243_v32, %v284_v47 }
 0x102   :  { %625 = vperm.xlu1 %923, %v595_v49   ;;  %v400_v15 = vpop.permute.xlu0 %399 }
 0x103   :  { %v339_v24 = vadd.f32 %v323_v19, %v239_v50 }
 0x105   :  { %v104_v51 = vpop.permute.xlu1 %103  ;;  %v439_v37 = vadd.f32 %v423_v22, %v339_v24 }
 0x106   :  { %630 = vperm.xlu1 %923, %v596_v40   ;;  %v141_v59 = vmul.f32 %v1216_v1, %v104_v51  ;;  %v440_v40 = vadd.f32 %v424_v0, %v1269_v8  ;;  %v408_v18 = vpop.permute.xlu0 %407 }
 0x107   :  { %v551_v16 = vadd.f32 %v1204_v56, %v439_v37  ;;  %v429_v24 = vmul.f32 %v1245_v35, %v408_v18 }
 0x109   :  { %v567_v20 = vmax.f32 %v551_v16, 0.0 }
 0x10a   :  { %635 = vperm.xlu1 %923, %v597_v58   ;;  %v192_v57 = vpop.permute.xlu1 %191  ;;  %v535_v37 = vpop.permute.xlu0 %534 }
 0x10b   :  { %v225_v14 = vmul.f32 %v1221_v4, %v192_v57 }
 0x10d   :  { %v241_v62 = vadd.f32 %v225_v14, %v141_v59 }
 0x10e   :  { %775 = vperm.xlu1 %923, %v741_v60  }
 0x10f   :  { %v380_v11 = vpop.permute.xlu1 %379 }
 0x110   :  { %v422_v25 = vmul.f32 %v1245_v35, %v380_v11 }
 0x112   :  { %v438_v26 = vadd.f32 %v422_v25, %v338_v46 }
 0x114   :  { %v495_v23 = vpop.permute.xlu1 %494 }
 0x115   :  { %v548_v17 = vadd.f32 %v495_v23, %v436_v55 }
 0x117   :  { %v564_v13 = vmax.f32 %v548_v17, 0.0 }
 0x118   :  { %v500_v7 = vpop.permute.xlu1 %499 }
 0x119   :  { %v549_v9 = vadd.f32 %v500_v7, %v437_v39 }
 0x11b   :  { %v565_v2 = vmax.f32 %v549_v9, 0.0 }
 0x11d   :  { %v585_v30 = vpack.c.bf16 %v565_v2, %v564_v13  ;;  %v292_v3 = vpop.permute.xlu1 %291  ;;  %v427_v2 = vmul.f32 %v1245_v35, %v400_v15 }
 0x11e   :  { %v325_v45 = vmul.f32 %v1243_v32, %v292_v3 }
 0x11f   :  { %844 = vmatprep.subr.bf16.mxu0 %v585_v30  ;;  %865 = vmatprep.subr.bf16.mxu1 %v585_v30 }
 0x120   :  { %845 = vmatpush3.bf16.msra.mxu0 %v585_v30  ;;  %873 = vmatpush3.bf16.msra.mxu1 %v585_v30  ;;  %v341_v47 = vadd.f32 %v325_v45, %v241_v62 }
 0x122   :  { %v109_v6 = vpop.permute.xlu1 %108 }
 0x123   :  { %v142_v62 = vmul.f32 %v1216_v1, %v109_v6 }
 0x127   :  { %v196_v53 = vpop.permute.xlu1 %195 }
 0x128   :  { %v226_v5 = vmul.f32 %v1221_v4, %v196_v53 }
 0x12a   :  { %v242_v17 = vadd.f32 %v226_v5, %v142_v62 }
 0x12b   :  { %v200_v34 = vpop.permute.xlu1 %199 }
 0x12c   :  { %v227_v21 = vmul.f32 %v1221_v4, %v200_v34 }
 0x12e   :  { %v243_v39 = vadd.f32 %v227_v21, %v143_v10 }
 0x130   :  { %v392_v61 = vpop.permute.xlu1 %391 }
 0x131   :  { %v425_v56 = vmul.f32 %v1245_v35, %v392_v61 }
 0x133   :  { %v441_v58 = vadd.f32 %v425_v56, %v341_v47 }
 0x135   :  { %v505_v27 = vpop.permute.xlu1 %504 }
 0x136   :  { %v550_v38 = vadd.f32 %v505_v27, %v438_v26 }
 0x138   :  { %v566_v28 = vmax.f32 %v550_v38, 0.0 }
 0x13a   :  { %v586_v31 = vpack.c.bf16 %v567_v20, %v566_v28  ;;  %v296_v44 = vpop.permute.xlu1 %295  ;;  %v928_v28 = vld [vmem:[%s1433_s3 + $0x18] sm:$0xff]   ;;  %v606_v20 = vpop.permute.xlu0 %605 }
 0x13b   :  { %v326_v8 = vmul.f32 %v1243_v32, %v296_v44 }
 0x13c   :  { %846 = vmatprep.subr.bf16.mxu0 %v586_v31  ;;  %866 = vmatprep.subr.bf16.mxu1 %v586_v31 }
 0x13d   :  { %847 = vmatpush3.bf16.msra.mxu0 %v586_v31  ;;  %874 = vmatpush3.bf16.msra.mxu1 %v586_v31  ;;  %v342_v13 = vadd.f32 %v326_v8, %v242_v17 }
 0x13e   :  { %v300_v41 = vpop.permute.xlu1 %299  ;;  %v616_v44 = vpop.permute.xlu0 %615 }
 0x13f   :  { %v327_v23 = vmul.f32 %v1243_v32, %v300_v41 }
 0x141   :  { %v343_v30 = vadd.f32 %v327_v23, %v243_v39 }
 0x143   :  { %v124_v42 = vpop.permute.xlu1 %123  ;;  %v443_v34 = vadd.f32 %v427_v2, %v343_v30 }
 0x144   :  { %v145_v3 = vmul.f32 %v1216_v1, %v124_v42  ;;  %v751_v42 = vpop.permute.xlu0 %750 }
 0x148   :  { %v208_v48 = vpop.permute.xlu1 %207  ;;  %v756_v43 = vpop.permute.xlu0 %755 }
 0x149   :  { %v229_v7 = vmul.f32 %v1221_v4, %v208_v48 }
 0x14b   :  { %v245_v53 = vadd.f32 %v229_v7, %v145_v3 }
 0x14c   :  { %v761_v0 = vpop.permute.xlu0 %760 }
 0x14d   :  { %v396_v29 = vpop.permute.xlu1 %395 }
 0x14e   :  { %v426_v9 = vmul.f32 %v1245_v35, %v396_v29 }
 0x150   :  { %v442_v19 = vadd.f32 %v426_v9, %v342_v13  ;;  %v766_v23 = vpop.permute.xlu0 %765 }
 0x152   :  { %v515_v49 = vpop.permute.xlu1 %514 }
 0x153   :  { %v552_v51 = vadd.f32 %v515_v49, %v440_v40 }
 0x155   :  { %v568_v14 = vmax.f32 %v552_v51, 0.0 }
 0x156   :  { %v520_v57 = vpop.permute.xlu1 %519 }
 0x157   :  { %v553_v59 = vadd.f32 %v520_v57, %v441_v58 }
 0x159   :  { %v569_v60 = vmax.f32 %v553_v59, 0.0 }
 0x15b   :  { %v587_v11 = vpack.c.bf16 %v569_v60, %v568_v14  ;;  %v308_v63 = vpop.permute.xlu1 %307 }
 0x15c   :  { %v329_v6 = vmul.f32 %v1243_v32, %v308_v63 }
 0x15d   :  { %848 = vmatprep.subr.bf16.mxu0 %v587_v11  ;;  %867 = vmatprep.subr.bf16.mxu1 %v587_v11 }
 0x15e   :  { %849 = vmatpush3.bf16.msra.mxu0 %v587_v11  ;;  %875 = vmatpush3.bf16.msra.mxu1 %v587_v11  ;;  %v345_v50 = vadd.f32 %v329_v6, %v245_v53 }
 0x160   :  { %v404_v55 = vpop.permute.xlu1 %403  ;;  %v445_v32 = vadd.f32 %v429_v24, %v345_v50 }
 0x161   :  { %v428_v54 = vmul.f32 %v1245_v35, %v404_v55  ;;  %v927_v35 = vld [vmem:[%s1433_s3 + $0x8] sm:$0xff]  }
 0x163   :  { %v444_v36 = vadd.f32 %v428_v54, %v1285_v52 }
 0x165   :  { %v525_v12 = vpop.permute.xlu1 %524  ;;  %v556_v25 = vadd.f32 %v535_v37, %v444_v36 }
 0x166   :  { %v554_v4 = vadd.f32 %v525_v12, %v442_v19  ;;  %v771_v12 = vpop.permute.xlu0 %770 }
 0x167   :  { %v572_v27 = vmax.f32 %v556_v25, 0.0 }
 0x168   :  { %v570_v1 = vmax.f32 %v554_v4, 0.0 }
 0x169   :  { %v530_v22 = vpop.permute.xlu1 %529 }
 0x16a   :  { %v555_v33 = vadd.f32 %v530_v22, %v443_v34  ;;  %v781_v37 = vpop.permute.xlu0 %780 }
 0x16c   :  { %v571_v61 = vmax.f32 %v555_v33, 0.0 }
 0x16d   :  { %v540_v46 = vpop.permute.xlu1 %539 }
 0x16e   :  { %v588_v26 = vpack.c.bf16 %v571_v61, %v570_v1  ;;  %v557_v16 = vadd.f32 %v540_v46, %v445_v32 }
 0x170   :  { %v573_v38 = vmax.f32 %v557_v16, 0.0  ;;  %850 = vmatprep.subr.bf16.mxu0 %v588_v26  ;;  %868 = vmatprep.subr.bf16.mxu1 %v588_v26 }
 0x171   :  { %851 = vmatpush3.bf16.msra.mxu0 %v588_v26  ;;  %876 = vmatpush3.bf16.msra.mxu1 %v588_v26  ;;  %v601_v31 = vpop.permute.xlu1 %600 }
 0x172   :  { %v589_v52 = vpack.c.bf16 %v573_v38, %v572_v27  ;;  %v805_v38 = vstv %s1436_s6 }
 0x174   :  { %852 = vmatprep.subr.bf16.mxu0 %v589_v52  ;;  %869 = vmatprep.subr.bf16.mxu1 %v589_v52 }
 0x175   :  { %853 = vmatpush3.bf16.msra.mxu0 %v589_v52  ;;  %877 = vmatpush3.bf16.msra.mxu1 %v589_v52  ;;  %v611_v41 = vpop.permute.xlu1 %610 }
 0x178   :  { %855 = vmatmul.mubr.bf16.vlgmr.msra.gmra.mrb[0].mxu0 %v927_v35  ;;  %859 = vmatmul.mubr.bf16.vlgmr.msra.gmra.mrb[0].mxu1 %v928_v28 }
 0x179   :  { %v746_v48 = vpop.permute.xlu1 %745 }
 0x17d   :  { %v621_v29 = vpop.permute.xlu1 %620 }
 0x181   :  { %v626_v45 = vpop.permute.xlu1 %625 }
 0x185   :  { %v631_v21 = vpop.permute.xlu1 %630 }
 0x189   :  { %v636_v30 = vpop.permute.xlu1 %635 }
 0x18d   :  { %v776_v22 = vpop.permute.xlu1 %775 }
 0x24b   :  { %v856_v56 = vpop.f32.mrb[0].mxu0  ;;  %v860_v49 = vpop.f32.mrb[0].mxu1 }
 0x24c   :  { %v696_v47 = vpop.f32.mrb[1].mxu0  ;;  %v712_v40 = vpop.f32.mrb[1].mxu1  ;;  %v705_v51 = vadd.f32 %v856_v56, %v611_v41  ;;  %v721_v9 = vadd.f32 %v860_v49, %v631_v21 }
 0x24d   :  { %v697_v58 = vadd.f32 %v696_v47, %v601_v31  ;;  %v857_v57 = vpop.f32.mrb[2].mxu0  ;;  %v861_v59 = vpop.f32.mrb[2].mxu1  ;;  %v713_v8 = vadd.f32 %v712_v40, %v621_v29 }
 0x24e   :  { %v699_v14 = vpop.f32.mrb[3].mxu0  ;;  %v715_v60 = vpop.f32.mrb[3].mxu1  ;;  %v708_v63 = vadd.f32 %v857_v57, %v616_v44  ;;  %v729_v62 = vmax.f32 %v705_v51, 0.0  ;;  %v724_v6 = vadd.f32 %v861_v59, %v636_v30  ;;  %v733_v53 = vmax.f32 %v721_v9, 0.0 }
 0x24f   :  { %v727_v11 = vmax.f32 %v697_v58, 0.0  ;;  %v700_v5 = vadd.f32 %v699_v14, %v606_v20  ;;  %v716_v39 = vadd.f32 %v715_v60, %v626_v45  ;;  %v731_v13 = vmax.f32 %v713_v8, 0.0 }
 0x250   :  { %v730_v55 = vmax.f32 %v708_v63, 0.0  ;;  %v785_v7 = vmul.f32 %v756_v43, %v729_v62  ;;  %v734_v36 = vmax.f32 %v724_v6, 0.0  ;;  %v789_v24 = vmul.f32 %v776_v22, %v733_v53 }
 0x251   :  { %v728_v10 = vmax.f32 %v700_v5, 0.0  ;;  %v783_v15 = vmul.f32 %v746_v48, %v727_v11  ;;  %v732_v18 = vmax.f32 %v716_v39, 0.0  ;;  %v787_v19 = vmul.f32 %v766_v23, %v731_v13 }
 0x252   :  { %v786_v3 = vmul.f32 %v761_v0, %v730_v55  ;;  %v790_v25 = vmul.f32 %v781_v37, %v734_v36 }
 0x253   :  { %v784_v17 = vmul.f32 %v751_v42, %v728_v10  ;;  %v788_v4 = vmul.f32 %v771_v12, %v732_v18 }
 0x255   :  { %v791_v2 = vadd.f32 %v784_v17, %v783_v15 }
 0x257   :  { %v792_v54 = vadd.f32 %v791_v2, %v785_v7 }
 0x259   :  { %v793_v50 = vadd.f32 %v792_v54, %v786_v3 }
 0x25b   :  { %v794_v34 = vadd.f32 %v793_v50, %v787_v19 }
 0x25d   :  { %v795_v33 = vadd.f32 %v794_v34, %v788_v4 }
 0x25f   :  { %v796_v1 = vadd.f32 %v795_v33, %v789_v24 }
 0x261   :  { %v797_v61 = vadd.f32 %v796_v1, %v790_v25 }
 0x263   :  { %v798_v32 = vrot.slane %v797_v61, 4 }
 0x265   :  { %v799_v46 = vadd.f32 %v798_v32, %v797_v61 }
 0x267   :  { %v800_v26 = vrot.slane %v799_v46, 2 }
 0x269   :  { %v801_v16 = vadd.f32 %v800_v26, %v799_v46 }
 0x26b   :  { %v802_v27 = vrot.slane %v801_v16, 1 }
 0x26d   :  { %v803_v52 = vadd.f32 %v802_v27, %v801_v16 }
 0x26f   :  { %v806_v35 = vadd.f32 %v805_v38, %v803_v52 }
 0x271   :  { %807 = vst [vmem:[#allocation3] sm:$0x1] %v806_v35 }
 0x272   :  { %940 = shalt.err (!%p937_p4)
}
 0x273   :  { %s941_s14 = scalar_lea.hbm %s1437_s7, 16 }
 0x274   :  { %p942_p5 = scmp.ne.s32.totalorder %s1437_s7, %s941_s14  ;;  %p945_p6 = scmp.lt.u32.totalorder %s941_s14, %s1437_s7 }
 0x276   :  { %p947_p7 = pnand %p945_p6, %p942_p5 }
 0x278   :  { %950 = shalt.err (!%p947_p7)
}
 0x279   :  { %817 = dma.vmem_to_hbm [thread:$0]  %s815_s10, 16, %s1437_s7, [#allocation4]  }
 0x27a   :  { %951 = dma.done.wait [#allocation4], 16  }
 0x27b   :  { %952 = vsyncadd [#allocation4], 4294967280 }
 0x27c   :  { %821 = vsyncpa [#allocation4], 1 }

</bundles_post_ra>
